<compile_context>
chip_gen: v7x
topology: tpu7x:2x2x1
jax: 0.10.0
libtpu: 0.0.40
codegen_flags: <defaults>
</compile_context>

<pallas_src>
import jax
import jax.numpy as jnp
from jax.experimental import pallas as pl
from jax.experimental.pallas import tpu as pltpu


def _maxout_kernel(x_ref, w_ref, b_ref, o_ref, acc_ref):
    # Grid: (batch tiles, out tiles, K tiles); K is innermost (reduction).
    k = pl.program_id(2)
    num_pieces = w_ref.shape[0]  # static

    @pl.when(k == 0)
    def _():
        acc_ref[...] = jnp.zeros_like(acc_ref)

    x = x_ref[...]  # (tm, tk), loaded once, reused for every piece
    for p in range(num_pieces):  # static unroll; each dot is a full MXU matmul
        acc_ref[p] = acc_ref[p] + jnp.dot(
            x, w_ref[p], preferred_element_type=jnp.float32)

    @pl.when(k == pl.num_programs(2) - 1)
    def _():
        # Bias add + max over pieces in f32, single cast + lane-dense store.
        y = acc_ref[0] + b_ref[0]            # b_ref[p]: (1, tn) broadcasts over tm
        for p in range(1, num_pieces):
            y = jnp.maximum(y, acc_ref[p] + b_ref[p])
        o_ref[...] = y.astype(o_ref.dtype)


def _pick_tile(dim, candidates):
    """Largest candidate that divides `dim`; else the full dim (always legal)."""
    for c in candidates:
        if dim % c == 0:
            return c
    return dim


def maxout(x, weights, biases, *, tm=None, tn=None, tk=None):
    """Maxout forward.

    x:       [batch, in_features]                       float32
    weights: [num_pieces, in_features, out_features]    (x @ W_p + b_p layout)
    biases:  [num_pieces, out_features]
    returns: [batch, out_features] = max_p (x @ W_p + b_p)
    """
    batch, in_features = x.shape
    num_pieces, _, out_features = weights.shape
    biases3d = biases.reshape(num_pieces, 1, out_features)

    # Tile sizes: lane-dense N (128/256), MXU-friendly K, moderate M; all
    # candidates keep the double-buffered weight slab + f32 accumulator well
    # under v7x's 32 MiB scoped VMEM. Fall back to full dims for small shapes.
    tm = tm or _pick_tile(batch, (512, 256, 128, 64, 32, 16, 8))
    tn = tn or _pick_tile(out_features, (256, 128))
    tk = tk or _pick_tile(in_features, (512, 256, 128))

    grid = (batch // tm, out_features // tn, in_features // tk)

    return pl.pallas_call(
        _maxout_kernel,
        out_shape=jax.ShapeDtypeStruct((batch, out_features), x.dtype),
        grid_spec=pltpu.PrefetchScalarGridSpec(
            num_scalar_prefetch=0,
            grid=grid,
            in_specs=[
                # x tile: constant across the out-tile axis -> stays resident.
                pl.BlockSpec((tm, tk), lambda i, j, k: (i, k)),
                # All pieces' weight slabs for this (k, j) tile in one block.
                pl.BlockSpec((num_pieces, tk, tn), lambda i, j, k: (0, k, j)),
                # All pieces' bias rows for this out tile.
                pl.BlockSpec((num_pieces, 1, tn), lambda i, j, k: (0, 0, j)),
            ],
            out_specs=pl.BlockSpec((tm, tn), lambda i, j, k: (i, j)),
            # Per-piece f32 running accumulators, resident across the K sweep.
            scratch_shapes=[pltpu.VMEM((num_pieces, tm, tn), jnp.float32)],
        ),
        compiler_params=pltpu.CompilerParams(
            # batch/out tiles are independent (megacore-shardable on v7x);
            # K is the reduction axis and must stay "arbitrary".
            dimension_semantics=("parallel", "parallel", "arbitrary"),
        ),
    )(x, weights, biases3d)


if __name__ == "__main__":
    key = jax.random.PRNGKey(0)

    def run_case(batch, in_features, out_features, num_pieces, case_key):
        kx, kw, kb = jax.random.split(case_key, 3)
        # Deterministic init mimicking nn.Linear's U(-1/sqrt(in), 1/sqrt(in)).
        bound = 1.0 / (in_features ** 0.5)
        weights = jax.random.uniform(
            kw, (num_pieces, in_features, out_features),
            minval=-bound, maxval=bound, dtype=jnp.float32)
        biases = jax.random.uniform(
            kb, (num_pieces, out_features),
            minval=-bound, maxval=bound, dtype=jnp.float32)
        x = jax.random.normal(kx, (batch, in_features), dtype=jnp.float32)

        out = jax.block_until_ready(maxout(x, weights, biases))

        # Pure-JAX reference: max over pieces of (x @ W_p + b_p).
        ref = jnp.max(
            jnp.einsum("bi,pio->pbo", x, weights,
                       precision=jax.lax.Precision.HIGHEST)
            + biases[:, None, :],
            axis=0)

        assert out.shape == (batch, out_features)
        assert jnp.allclose(out, ref, atol=1e-3, rtol=1e-3), float(
            jnp.max(jnp.abs(out - ref)))

    k1, k2 = jax.random.split(key)
    # Small shape matching the module spec (whole-array blocks, grid (1,1,1)).
    run_case(batch=8, in_features=32, out_features=64, num_pieces=4, case_key=k1)
    # Larger shape exercising the tiled (M, N, K) pipeline + K accumulation.
    run_case(batch=128, in_features=384, out_features=384, num_pieces=3,
             case_key=k2)

    print("KERNEL_OK")
</pallas_src>

<mosaic_0001>
module attributes {stable_mosaic.version = 11 : i64} {
  func.func @_maxout_kernel(%arg0: i32, %arg1: i32, %arg2: i32, %arg3: memref<8x32xf32, #tpu.memory_space<vmem>>, %arg4: memref<4x32x64xf32, #tpu.memory_space<vmem>>, %arg5: memref<4x1x64xf32, #tpu.memory_space<vmem>>, %arg6: memref<8x64xf32, #tpu.memory_space<vmem>>, %arg7: memref<4x8x64xf32, #tpu.memory_space<vmem>>) attributes {dimension_semantics = [#tpu.dimension_semantics<parallel>, #tpu.dimension_semantics<parallel>, #tpu.dimension_semantics<arbitrary>], iteration_bounds = array<i64: 1, 1, 1>, scalar_prefetch = 0 : i64, scratch_operands = 1 : i64, tpu.core_type = #tpu.core_type<tc>, window_params = [{transform_indices = @transform_0, window_bounds = array<i64: 8, 32>}, {transform_indices = @transform_1, window_bounds = array<i64: 4, 32, 64>}, {transform_indices = @transform_2, window_bounds = array<i64: 4, 1, 64>}, {transform_indices = @transform_3, window_bounds = array<i64: 8, 64>}]} {
    %c0_i32 = arith.constant 0 : i32
    %0 = arith.cmpi eq, %arg2, %c0_i32 : i32
    %1 = arith.extui %0 : i1 to i32
    %c0_i32_0 = arith.constant 0 : i32
    %2 = arith.cmpi ne, %1, %c0_i32_0 : i32
    scf.if %2 {
      %cst_40 = arith.constant 0.000000e+00 : f32
      %43 = vector.broadcast %cst_40 : f32 to vector<4x8x64xf32>
      %c0_41 = arith.constant 0 : index
      %c0_42 = arith.constant 0 : index
      %c0_43 = arith.constant 0 : index
      %44 = vector.load %arg7[%c0_41, %c0_42, %c0_43] : memref<4x8x64xf32, #tpu.memory_space<vmem>>, vector<4x8x64xf32>
      tpu.vector_store %arg7[%c0_41, %c0_42, %c0_43], %43 {strides = array<i32>} : memref<4x8x64xf32, #tpu.memory_space<vmem>>, vector<4x8x64xf32>,
    } else {
    }
    %c0 = arith.constant 0 : index
    %c0_1 = arith.constant 0 : index
    %3 = vector.load %arg3[%c0, %c0_1] : memref<8x32xf32, #tpu.memory_space<vmem>>, vector<8x32xf32>
    %c0_2 = arith.constant 0 : index
    %c0_3 = arith.constant 0 : index
    %c0_4 = arith.constant 0 : index
    %4 = vector.load %arg7[%c0_2, %c0_3, %c0_4] : memref<4x8x64xf32, #tpu.memory_space<vmem>>, vector<1x8x64xf32>
    %5 = vector.shape_cast %4 : vector<1x8x64xf32> to vector<8x64xf32>
    %c0_5 = arith.constant 0 : index
    %c0_6 = arith.constant 0 : index
    %c0_7 = arith.constant 0 : index
    %6 = vector.load %arg4[%c0_5, %c0_6, %c0_7] : memref<4x32x64xf32, #tpu.memory_space<vmem>>, vector<1x32x64xf32>
    %7 = vector.shape_cast %6 : vector<1x32x64xf32> to vector<32x64xf32>
    %cst = arith.constant dense<0.000000e+00> : vector<8x64xf32>
    %8 = tpu.matmul %3, %7, %cst {dimension_numbers = #tpu.dot_dimension_numbers<[1], [0], [0], [1], [0, 0, 1, 1], [], []>} : vector<8x32xf32>, vector<32x64xf32>, vector<8x64xf32> -> vector<8x64xf32>
    %9 = arith.addf %5, %8 : vector<8x64xf32>
    %c0_8 = arith.constant 0 : index
    %c0_9 = arith.constant 0 : index
    %c0_10 = arith.constant 0 : index
    %10 = vector.load %arg7[%c0_8, %c0_9, %c0_10] : memref<4x8x64xf32, #tpu.memory_space<vmem>>, vector<1x8x64xf32>
    %11 = vector.shape_cast %10 : vector<1x8x64xf32> to vector<8x64xf32>
    %12 = vector.shape_cast %9 : vector<8x64xf32> to vector<1x8x64xf32>
    tpu.vector_store %arg7[%c0_8, %c0_9, %c0_10], %12 {strides = array<i32>} : memref<4x8x64xf32, #tpu.memory_space<vmem>>, vector<1x8x64xf32>,
    %c1 = arith.constant 1 : index
    %c0_11 = arith.constant 0 : index
    %c0_12 = arith.constant 0 : index
    %13 = vector.load %arg7[%c1, %c0_11, %c0_12] : memref<4x8x64xf32, #tpu.memory_space<vmem>>, vector<1x8x64xf32>
    %14 = vector.shape_cast %13 : vector<1x8x64xf32> to vector<8x64xf32>
    %c1_13 = arith.constant 1 : index
    %c0_14 = arith.constant 0 : index
    %c0_15 = arith.constant 0 : index
    %15 = vector.load %arg4[%c1_13, %c0_14, %c0_15] : memref<4x32x64xf32, #tpu.memory_space<vmem>>, vector<1x32x64xf32>
    %16 = vector.shape_cast %15 : vector<1x32x64xf32> to vector<32x64xf32>
    %cst_16 = arith.constant dense<0.000000e+00> : vector<8x64xf32>
    %17 = tpu.matmul %3, %16, %cst_16 {dimension_numbers = #tpu.dot_dimension_numbers<[1], [0], [0], [1], [0, 0, 1, 1], [], []>} : vector<8x32xf32>, vector<32x64xf32>, vector<8x64xf32> -> vector<8x64xf32>
    %18 = arith.addf %14, %17 : vector<8x64xf32>
    %c1_17 = arith.constant 1 : index
    %c0_18 = arith.constant 0 : index
    %c0_19 = arith.constant 0 : index
    %19 = vector.load %arg7[%c1_17, %c0_18, %c0_19] : memref<4x8x64xf32, #tpu.memory_space<vmem>>, vector<1x8x64xf32>
    %20 = vector.shape_cast %19 : vector<1x8x64xf32> to vector<8x64xf32>
    %21 = vector.shape_cast %18 : vector<8x64xf32> to vector<1x8x64xf32>
    tpu.vector_store %arg7[%c1_17, %c0_18, %c0_19], %21 {strides = array<i32>} : memref<4x8x64xf32, #tpu.memory_space<vmem>>, vector<1x8x64xf32>,
    %c2 = arith.constant 2 : index
    %c0_20 = arith.constant 0 : index
    %c0_21 = arith.constant 0 : index
    %22 = vector.load %arg7[%c2, %c0_20, %c0_21] : memref<4x8x64xf32, #tpu.memory_space<vmem>>, vector<1x8x64xf32>
    %23 = vector.shape_cast %22 : vector<1x8x64xf32> to vector<8x64xf32>
    %c2_22 = arith.constant 2 : index
    %c0_23 = arith.constant 0 : index
    %c0_24 = arith.constant 0 : index
    %24 = vector.load %arg4[%c2_22, %c0_23, %c0_24] : memref<4x32x64xf32, #tpu.memory_space<vmem>>, vector<1x32x64xf32>
    %25 = vector.shape_cast %24 : vector<1x32x64xf32> to vector<32x64xf32>
    %cst_25 = arith.constant dense<0.000000e+00> : vector<8x64xf32>
    %26 = tpu.matmul %3, %25, %cst_25 {dimension_numbers = #tpu.dot_dimension_numbers<[1], [0], [0], [1], [0, 0, 1, 1], [], []>} : vector<8x32xf32>, vector<32x64xf32>, vector<8x64xf32> -> vector<8x64xf32>
    %27 = arith.addf %23, %26 : vector<8x64xf32>
    %c2_26 = arith.constant 2 : index
    %c0_27 = arith.constant 0 : index
    %c0_28 = arith.constant 0 : index
    %28 = vector.load %arg7[%c2_26, %c0_27, %c0_28] : memref<4x8x64xf32, #tpu.memory_space<vmem>>, vector<1x8x64xf32>
    %29 = vector.shape_cast %28 : vector<1x8x64xf32> to vector<8x64xf32>
    %30 = vector.shape_cast %27 : vector<8x64xf32> to vector<1x8x64xf32>
    tpu.vector_store %arg7[%c2_26, %c0_27, %c0_28], %30 {strides = array<i32>} : memref<4x8x64xf32, #tpu.memory_space<vmem>>, vector<1x8x64xf32>,
    %c3 = arith.constant 3 : index
    %c0_29 = arith.constant 0 : index
    %c0_30 = arith.constant 0 : index
    %31 = vector.load %arg7[%c3, %c0_29, %c0_30] : memref<4x8x64xf32, #tpu.memory_space<vmem>>, vector<1x8x64xf32>
    %32 = vector.shape_cast %31 : vector<1x8x64xf32> to vector<8x64xf32>
    %c3_31 = arith.constant 3 : index
    %c0_32 = arith.constant 0 : index
    %c0_33 = arith.constant 0 : index
    %33 = vector.load %arg4[%c3_31, %c0_32, %c0_33] : memref<4x32x64xf32, #tpu.memory_space<vmem>>, vector<1x32x64xf32>
    %34 = vector.shape_cast %33 : vector<1x32x64xf32> to vector<32x64xf32>
    %cst_34 = arith.constant dense<0.000000e+00> : vector<8x64xf32>
    %35 = tpu.matmul %3, %34, %cst_34 {dimension_numbers = #tpu.dot_dimension_numbers<[1], [0], [0], [1], [0, 0, 1, 1], [], []>} : vector<8x32xf32>, vector<32x64xf32>, vector<8x64xf32> -> vector<8x64xf32>
    %36 = arith.addf %32, %35 : vector<8x64xf32>
    %c3_35 = arith.constant 3 : index
    %c0_36 = arith.constant 0 : index
    %c0_37 = arith.constant 0 : index
    %37 = vector.load %arg7[%c3_35, %c0_36, %c0_37] : memref<4x8x64xf32, #tpu.memory_space<vmem>>, vector<1x8x64xf32>
    %38 = vector.shape_cast %37 : vector<1x8x64xf32> to vector<8x64xf32>
    %39 = vector.shape_cast %36 : vector<8x64xf32> to vector<1x8x64xf32>
    tpu.vector_store %arg7[%c3_35, %c0_36, %c0_37], %39 {strides = array<i32>} : memref<4x8x64xf32, #tpu.memory_space<vmem>>, vector<1x8x64xf32>,
    %c0_i32_38 = arith.constant 0 : i32
    %40 = arith.cmpi eq, %arg2, %c0_i32_38 : i32
    %41 = arith.extui %40 : i1 to i32
    %c0_i32_39 = arith.constant 0 : i32
    %42 = arith.cmpi ne, %41, %c0_i32_39 : i32
    scf.if %42 {
      %c0_40 = arith.constant 0 : index
      %c0_41 = arith.constant 0 : index
      %c0_42 = arith.constant 0 : index
      %43 = vector.load %arg7[%c0_40, %c0_41, %c0_42] : memref<4x8x64xf32, #tpu.memory_space<vmem>>, vector<1x8x64xf32>
      %44 = vector.shape_cast %43 : vector<1x8x64xf32> to vector<8x64xf32>
      %c0_43 = arith.constant 0 : index
      %c0_44 = arith.constant 0 : index
      %c0_45 = arith.constant 0 : index
      %45 = vector.load %arg5[%c0_43, %c0_44, %c0_45] : memref<4x1x64xf32, #tpu.memory_space<vmem>>, vector<1x1x64xf32>
      %46 = vector.shape_cast %45 : vector<1x1x64xf32> to vector<1x64xf32>
      %47 = vector.broadcast %46 : vector<1x64xf32> to vector<8x64xf32>
      %48 = arith.addf %44, %47 : vector<8x64xf32>
      %c1_46 = arith.constant 1 : index
      %c0_47 = arith.constant 0 : index
      %c0_48 = arith.constant 0 : index
      %49 = vector.load %arg7[%c1_46, %c0_47, %c0_48] : memref<4x8x64xf32, #tpu.memory_space<vmem>>, vector<1x8x64xf32>
      %50 = vector.shape_cast %49 : vector<1x8x64xf32> to vector<8x64xf32>
      %c1_49 = arith.constant 1 : index
      %c0_50 = arith.constant 0 : index
      %c0_51 = arith.constant 0 : index
      %51 = vector.load %arg5[%c1_49, %c0_50, %c0_51] : memref<4x1x64xf32, #tpu.memory_space<vmem>>, vector<1x1x64xf32>
      %52 = vector.shape_cast %51 : vector<1x1x64xf32> to vector<1x64xf32>
      %53 = vector.broadcast %52 : vector<1x64xf32> to vector<8x64xf32>
      %54 = arith.addf %50, %53 : vector<8x64xf32>
      %55 = arith.maximumf %48, %54 : vector<8x64xf32>
      %c2_52 = arith.constant 2 : index
      %c0_53 = arith.constant 0 : index
      %c0_54 = arith.constant 0 : index
      %56 = vector.load %arg7[%c2_52, %c0_53, %c0_54] : memref<4x8x64xf32, #tpu.memory_space<vmem>>, vector<1x8x64xf32>
      %57 = vector.shape_cast %56 : vector<1x8x64xf32> to vector<8x64xf32>
      %c2_55 = arith.constant 2 : index
      %c0_56 = arith.constant 0 : index
      %c0_57 = arith.constant 0 : index
      %58 = vector.load %arg5[%c2_55, %c0_56, %c0_57] : memref<4x1x64xf32, #tpu.memory_space<vmem>>, vector<1x1x64xf32>
      %59 = vector.shape_cast %58 : vector<1x1x64xf32> to vector<1x64xf32>
      %60 = vector.broadcast %59 : vector<1x64xf32> to vector<8x64xf32>
      %61 = arith.addf %57, %60 : vector<8x64xf32>
      %62 = arith.maximumf %55, %61 : vector<8x64xf32>
      %c3_58 = arith.constant 3 : index
      %c0_59 = arith.constant 0 : index
      %c0_60 = arith.constant 0 : index
      %63 = vector.load %arg7[%c3_58, %c0_59, %c0_60] : memref<4x8x64xf32, #tpu.memory_space<vmem>>, vector<1x8x64xf32>
      %64 = vector.shape_cast %63 : vector<1x8x64xf32> to vector<8x64xf32>
      %c3_61 = arith.constant 3 : index
      %c0_62 = arith.constant 0 : index
      %c0_63 = arith.constant 0 : index
      %65 = vector.load %arg5[%c3_61, %c0_62, %c0_63] : memref<4x1x64xf32, #tpu.memory_space<vmem>>, vector<1x1x64xf32>
      %66 = vector.shape_cast %65 : vector<1x1x64xf32> to vector<1x64xf32>
      %67 = vector.broadcast %66 : vector<1x64xf32> to vector<8x64xf32>
      %68 = arith.addf %64, %67 : vector<8x64xf32>
      %69 = arith.maximumf %62, %68 : vector<8x64xf32>
      %c0_64 = arith.constant 0 : index
      %c0_65 = arith.constant 0 : index
      %70 = vector.load %arg6[%c0_64, %c0_65] : memref<8x64xf32, #tpu.memory_space<vmem>>, vector<8x64xf32>
      tpu.vector_store %arg6[%c0_64, %c0_65], %69 {strides = array<i32>} : memref<8x64xf32, #tpu.memory_space<vmem>>, vector<8x64xf32>,
    } else {
    }
    return
  }
  func.func @transform_0(%arg0: i32, %arg1: i32, %arg2: i32) -> (i32, i32) {
    %c0_i32 = arith.constant 0 : i32
    return %arg0, %arg2 : i32, i32
  }
  func.func @transform_1(%arg0: i32, %arg1: i32, %arg2: i32) -> (i32, i32, i32) {
    %c0_i32 = arith.constant 0 : i32
    %c0_i32_0 = arith.constant 0 : i32
    return %c0_i32, %arg2, %arg1 : i32, i32, i32
  }
  func.func @transform_2(%arg0: i32, %arg1: i32, %arg2: i32) -> (i32, i32, i32) {
    %c0_i32 = arith.constant 0 : i32
    %c0_i32_0 = arith.constant 0 : i32
    %c0_i32_1 = arith.constant 0 : i32
    return %c0_i32, %c0_i32_0, %arg1 : i32, i32, i32
  }
  func.func @transform_3(%arg0: i32, %arg1: i32, %arg2: i32) -> (i32, i32) {
    %c0_i32 = arith.constant 0 : i32
    return %arg0, %arg1 : i32, i32
  }
}

</mosaic_0001>

<bundles_post_ra>
// kernel: tpu_custom_call.1
= control target key start
LH: loop header
LB: loop body
LE: loop exit
PB: predicated region body
PF: predicated region fallthrough
CT: control target
= control target key end

     0   :  { %8 = vsyncpa [#allocation4], 0  ;;  %s711_s0 = inlined_call_operand.hbm [shape: f32[8,32], index: 0, kind: input, shape index: {}]   ;;  %s712_s1 = inlined_call_operand.hbm [shape: f32[4,32,64], index: 1, kind: input, shape index: {}]   ;;  %s713_s2 = inlined_call_operand.vmem [shape: f32[4,1,64], index: 2, kind: input, shape index: {}]   ;;  %s714_s3 = inlined_call_operand.hbm [shape: f32[8,64], index: 3, kind: output, shape index: {}]  }
   0x1   :  { %9 = vsyncpa [#allocation7], 0 }
   0x2   :  { %10 = vsyncpa [#allocation5], 0  ;;  %s611_s12 = smov [#allocation3]   ;;  %s612_s14 = smov [#allocation6]  }
   0x3   :  { %s17_s13 = sshll.u32 %s611_s12, 4  ;;  %s26_s15 = sshll.u32 %s612_s14, 4  ;;  %s18_s13 = int_to_ptr.vmem [resolvable:$true] %s17_s13  ;;  %s639_s15 = int_to_ptr.vmem [resolvable:$true] %s26_s15 }
   0x4   :  { %s539_s18 = scalar_lea.hbm %s711_s0, 128 }
   0x5   :  { %p540_p0 = scmp.ne.s32.totalorder %s711_s0, %s539_s18  ;;  %p543_p1 = scmp.lt.u32.totalorder %s539_s18, %s711_s0 }
   0x7   :  { %p545_p2 = pnand %p543_p1, %p540_p0 }
   0x9   :  { %548 = shalt.err (!%p545_p2)
}
   0xa   :  { %s549_s23 = scalar_lea.vmem %s18_s13, 128  ;;  %p554_p4 = scmp.lt.s32.totalorder %s18_s13, %s18_s13 }
   0xb   :  { %p550_p3 = scmp.ne.s32.totalorder %s18_s13, %s549_s23  ;;  %p555_p5 = scmp.lt.s32.totalorder %s549_s23, %s549_s23 }
   0xd   :  { %p556_p6 = por %p555_p5, %p554_p4 }
   0xf   :  { %p557_p7 = pnand %p556_p6, %p550_p3 }
  0x11   :  { %560 = shalt.err (!%p557_p7)
}
  0x12   :  { %20 = dma.hbm_to_vmem [thread:$0]  %s711_s0, 128, %s18_s13, [#allocation4]  }
  0x13   :  { %s561_s28 = scalar_lea.hbm %s712_s1, 2048 }
  0x14   :  { %p562_p8 = scmp.ne.s32.totalorder %s712_s1, %s561_s28  ;;  %p565_p9 = scmp.lt.u32.totalorder %s561_s28, %s712_s1 }
  0x16   :  { %p567_p10 = pnand %p565_p9, %p562_p8 }
  0x18   :  { %570 = shalt.err (!%p567_p10)
}
  0x19   :  { %s571_s6 = scalar_lea.vmem %s639_s15, 2048  ;;  %p576_p12 = scmp.lt.s32.totalorder %s639_s15, %s639_s15 }
  0x1a   :  { %p572_p11 = scmp.ne.s32.totalorder %s639_s15, %s571_s6  ;;  %p577_p13 = scmp.lt.s32.totalorder %s571_s6, %s571_s6 }
  0x1c   :  { %p578_p0 = por %p577_p13, %p576_p12 }
  0x1e   :  { %p579_p1 = pnand %p578_p0, %p572_p11 }
  0x20   :  { %582 = shalt.err (!%p579_p1)
}
  0x21   :  { %s613_s0 = smov 128   ;;  %s614_s7 = smov 8  }
  0x22   :  { %32 = dma.hbm_to_vmem [thread:$0]  %s712_s1, 2048, %s639_s15, [#allocation7], %s613_s0, %s613_s0, %s614_s7  }
  0x23   :  { %605 = dma.done.wait [#allocation4], 128  }
  0x24   :  { %606 = vsyncadd [#allocation4], 4294967168 }
  0x25   :  { %607 = dma.done.wait [#allocation7], 2048  }
  0x26   :  { %608 = vsyncadd [#allocation7], 4294965248  ;;  %v615_v0 = vmov 0.0|0.0   ;;  %vm45_vm0 = vcmask 523264   ;;  %vm616_vm1 = vmmov 0   ;;  %v617_v1 = vmov 0.0  }
  0x27   :  { %507 = vmatprep.subr.bf16.mxu0 %v615_v0  ;;  %513 = vmatprep.subr.bf16.mxu1 %v615_v0  ;;  %46 = vst.msk [vmem:[#allocation2] sm:$0xff] %vm45_vm0, %v617_v1  ;;  %47 = vst.msk [vmem:[#allocation2 + $0x8] sm:$0xff] %vm45_vm0, %v617_v1  ;;  %v52_v2 = vld [vmem:[#allocation6] sm:$0xff]  ;;  %v53_v3 = vld [vmem:[#allocation6 + $0x8] sm:$0xff]  ;;  %vm56_vm2 = vcmask 261120   ;;  %s618_s17 = smov [#allocation8]  }
  0x28   :  { %471 = vmatprep.mubr.msk.f32.mxu0 %vm616_vm1, %v617_v1  ;;  %482 = vmatprep.mubr.msk.f32.mxu1 %vm616_vm1, %v617_v1  ;;  %48 = vst.msk [vmem:[#allocation2 + $0x10] sm:$0xff] %vm45_vm0, %v617_v1  ;;  %49 = vst.msk [vmem:[#allocation2 + $0x18] sm:$0xff] %vm45_vm0, %v617_v1  ;;  %v136_v4 = vld [vmem:[#allocation6 + $0x20] sm:$0xff]  ;;  %v508_v5 = vpack.c.bf16 %v53_v3, %v52_v2  ;;  %v137_v6 = vld [vmem:[#allocation6 + $0x28] sm:$0xff]  ;;  %s422_s18 = sshll.u32 %s618_s17, 4  ;;  %s423_s18 = int_to_ptr.vmem [resolvable:$true] %s422_s18 }
  0x29   :  { %v54_v7 = vld [vmem:[#allocation6 + $0x10] sm:$0xff]  ;;  %v55_v8 = vld [vmem:[#allocation6 + $0x18] sm:$0xff]  ;;  %v514_v9 = vpack.c.bf16 %v137_v6, %v136_v4  ;;  %v215_v14 = vld [vmem:[#allocation6 + $0x40] sm:$0xff]  ;;  %s583_s19 = scalar_lea.vmem %s423_s18, 128  ;;  %p588_p3 = scmp.lt.s32.totalorder %s423_s18, %s423_s18 }
  0x2a   :  { %v138_v10 = vld [vmem:[#allocation6 + $0x30] sm:$0xff]  ;;  %v139_v11 = vld [vmem:[#allocation6 + $0x38] sm:$0xff]  ;;  %509 = vmatpush3.bf16.msra.mxu0 %v508_v5  ;;  %v511_v12 = vpack.c.bf16 %v55_v8, %v54_v7  ;;  %v216_v15 = vld [vmem:[#allocation6 + $0x48] sm:$0xff]  ;;  %p584_p2 = scmp.ne.s32.totalorder %s423_s18, %s583_s19  ;;  %p589_p4 = scmp.lt.s32.totalorder %s583_s19, %s583_s19 }
  0x2b   :  { %515 = vmatpush3.bf16.msra.mxu1 %v514_v9  ;;  %510 = vmatprep.subr.bf16.mxu0 %v615_v0  ;;  %v517_v13 = vpack.c.bf16 %v139_v11, %v138_v10  ;;  %v294_v16 = vld [vmem:[#allocation6 + $0x60] sm:$0xff]  ;;  %v295_v17 = vld [vmem:[#allocation6 + $0x68] sm:$0xff]  ;;  %v50_v18 = vld [vmem:[#allocation3] sm:$0xff]  ;;  %v520_v19 = vpack.c.bf16 %v216_v15, %v215_v14 }
  0x2c   :  { %516 = vmatprep.subr.bf16.mxu1 %v615_v0  ;;  %v526_v20 = vpack.c.bf16 %v295_v17, %v294_v16  ;;  %v217_v21 = vld [vmem:[#allocation6 + $0x50] sm:$0xff]  ;;  %v218_v22 = vld [vmem:[#allocation6 + $0x58] sm:$0xff]  ;;  %p590_p5 = por %p589_p4, %p588_p3 }
  0x2d   :  { %v296_v23 = vld [vmem:[#allocation6 + $0x70] sm:$0xff]  ;;  %v297_v24 = vld [vmem:[#allocation6 + $0x78] sm:$0xff]  ;;  %v523_v25 = vpack.c.bf16 %v218_v22, %v217_v21 }
  0x2e   :  { %512 = vmatpush3.bf16.msra.mxu0 %v511_v12  ;;  %v529_v26 = vpack.c.bf16 %v297_v24, %v296_v23  ;;  %v51_v27 = vld [vmem:[#allocation2] sm:$0xff]  ;;  %v134_v28 = vld [vmem:[#allocation2 + $0x8] sm:$0xff]  ;;  %p591_p6 = pnand %p590_p5, %p584_p2 }
  0x2f   :  { %518 = vmatpush3.bf16.msra.mxu1 %v517_v13  ;;  %519 = vmatprep.subr.bf16.mxu0 %v615_v0  ;;  %v213_v35 = vld [vmem:[#allocation2 + $0x10] sm:$0xff]  ;;  %v292_v36 = vld [vmem:[#allocation2 + $0x18] sm:$0xff]  ;;  %v436_v43 = vld [vmem:[%s713_s2] ss:$0 sm:$0xff] }
  0x30   :  { %525 = vmatprep.subr.bf16.mxu1 %v615_v0  ;;  %v438_v46 = vld [vmem:[%s713_s2 + $0x1] ss:$0 sm:$0xff]  ;;  %v440_v49 = vld [vmem:[%s713_s2 + $0x2] ss:$0 sm:$0xff]  ;;  %v442_v50 = vld [vmem:[%s713_s2 + $0x3] ss:$0 sm:$0xff] }
  0x31   :  { %472 = vmatmul.mubr.msk.f32.vlgmr.msra.gmra.mrb[0].mxu0 %vm56_vm2, %v50_v18 }
  0x32   :  { %483 = vmatmul.mubr.msk.f32.vlgmr.msra.gmra.mrb[0].mxu1 %vm56_vm2, %v50_v18  ;;  %521 = vmatpush3.bf16.msra.mxu0 %v520_v19 }
  0x33   :  { %527 = vmatpush3.bf16.msra.mxu1 %v526_v20  ;;  %522 = vmatprep.subr.bf16.mxu0 %v615_v0 }
  0x34   :  { %528 = vmatprep.subr.bf16.mxu1 %v615_v0  ;;  %493 = vmatprep.mubr.msk.f32.mxu0 %vm616_vm1, %v617_v1 }
  0x35   :  { %504 = vmatprep.mubr.msk.f32.mxu1 %vm616_vm1, %v617_v1 }
  0x36   :  { %524 = vmatpush3.bf16.msra.mxu0 %v523_v25 }
  0x37   :  { %530 = vmatpush3.bf16.msra.mxu1 %v529_v26 }
  0x39   :  { %494 = vmatmul.mubr.msk.f32.vlgmr.msra.gmra.mrb[2].mxu0 %vm56_vm2, %v50_v18 }
  0x3a   :  { %505 = vmatmul.mubr.msk.f32.vlgmr.msra.gmra.mrb[2].mxu1 %vm56_vm2, %v50_v18 }
 0x104   :  { %v126_v29 = vpop.f32.mrb[0].mxu0 }
 0x105   :  { %v130_v30 = vadd.f32 %v126_v29, %v51_v27  ;;  %v473_v31 = vpop.f32.mrb[1].mxu0  ;;  %v206_v32 = vpop.f32.mrb[0].mxu1 }
 0x106   :  { %v210_v33 = vadd.f32 %v206_v32, %v134_v28  ;;  %v484_v34 = vpop.f32.mrb[1].mxu1 }
 0x107   :  { %132 = vst.msk [vmem:[#allocation2] sm:$0xff] %vm45_vm0, %v130_v30 }
 0x108   :  { %211 = vst.msk [vmem:[#allocation2 + $0x8] sm:$0xff] %vm45_vm0, %v210_v33 }
 0x10c   :  { %v285_v37 = vpop.f32.mrb[2].mxu0 }
 0x10d   :  { %v289_v38 = vadd.f32 %v285_v37, %v213_v35  ;;  %v495_v39 = vpop.f32.mrb[3].mxu0  ;;  %v364_v40 = vpop.f32.mrb[2].mxu1 }
 0x10e   :  { %v368_v41 = vadd.f32 %v364_v40, %v292_v36  ;;  %v506_v42 = vpop.f32.mrb[3].mxu1  ;;  %v373_v44 = vld [vmem:[#allocation2] sm:$0xff] }
 0x10f   :  { %290 = vst.msk [vmem:[#allocation2 + $0x10] sm:$0xff] %vm45_vm0, %v289_v38  ;;  %v382_v45 = vld [vmem:[#allocation2 + $0x8] sm:$0xff]  ;;  %v381_v47 = vadd.f32 %v436_v43, %v373_v44 }
 0x110   :  { %369 = vst.msk [vmem:[#allocation2 + $0x18] sm:$0xff] %vm45_vm0, %v368_v41  ;;  %v391_v48 = vadd.f32 %v438_v46, %v382_v45 }
 0x112   :  { %v392_v52 = vmax.f32 %v381_v47, %v391_v48 }
 0x116   :  { %v393_v51 = vld [vmem:[#allocation2 + $0x10] sm:$0xff] }
 0x117   :  { %v402_v53 = vadd.f32 %v440_v49, %v393_v51  ;;  %v404_v54 = vld [vmem:[#allocation2 + $0x18] sm:$0xff] }
 0x118   :  { %v413_v55 = vadd.f32 %v442_v50, %v404_v54 }
 0x119   :  { %v403_v56 = vmax.f32 %v392_v52, %v402_v53 }
 0x11b   :  { %v414_v57 = vmax.f32 %v403_v56, %v413_v55 }
 0x11d   :  { %415 = vst.msk [vmem:[#allocation8] sm:$0xff] %vm45_vm0, %v414_v57 }
 0x11e   :  { %594 = shalt.err (!%p591_p6)
}
 0x11f   :  { %s595_s21 = scalar_lea.hbm %s714_s3, 128 }
 0x120   :  { %p596_p7 = scmp.ne.s32.totalorder %s714_s3, %s595_s21  ;;  %p599_p8 = scmp.lt.u32.totalorder %s595_s21, %s714_s3 }
 0x122   :  { %p601_p9 = pnand %p599_p8, %p596_p7 }
 0x124   :  { %604 = shalt.err (!%p601_p9)
}
 0x125   :  { %425 = dma.vmem_to_hbm [thread:$0]  %s423_s18, 128, %s714_s3, [#allocation5]  }
 0x126   :  { %609 = dma.done.wait [#allocation5], 128  }
 0x127   :  { %610 = vsyncadd [#allocation5], 4294967168 }
 0x128   :  { %429 = vsyncpa [#allocation4], 1 }
 0x129   :  { %430 = vsyncpa [#allocation7], 1 }
 0x12a   :  { %431 = vsyncpa [#allocation5], 1 }

</bundles_post_ra>
